<compile_context>
chip_gen: v6e
topology: v6e:2x2x1
jax: 0.10.0
libtpu: 0.0.40
codegen_flags: <defaults>
</compile_context>

<pallas_src>
import functools

import jax
import jax.numpy as jnp
from jax.experimental import pallas as pl
from jax.experimental.pallas import tpu as pltpu

EPS = 1e-12  # F.normalize default eps; denom = max(norm, eps)  ->  rsqrt(max(sumsq, eps^2))


def _embed_kernel(x_ref, wbt_ref, bbt_ref, wat_ref, bat_ref, cent_ref,
                  layers_ref, vlad_ref, acc_ref, asum_ref,
                  *, use_mxu_conv, mask_tail, l_total):
    """Fused base_model (1x1 conv + ReLU) + NetVLAD assignment/aggregation + normalizations.

    Grid is (N, L_pad//TM); acc_ref (D, K) and asum_ref (K, 1) accumulate the VLAD terms across the
    L-axis in VMEM.  The normalized vlad block is written once per sample at the last L-step.
    """
    i = pl.program_id(1)

    @pl.when(i == 0)
    def _init():
        acc_ref[...] = jnp.zeros_like(acc_ref)
        asum_ref[...] = jnp.zeros_like(asum_ref)

    xb = x_ref[0]                       # (C, TM)  channels on sublanes, spatial rows on lanes
    wbt = wbt_ref[...]                  # (D, C)
    bb = bbt_ref[...]                   # (D, 1)
    C = xb.shape[0]
    D = wbt.shape[0]
    TM = xb.shape[1]

    # base_model 1x1 conv + ReLU.  Tiny contraction (C_in=4): VPU broadcast-MACs at small D; at
    # production D the MXU path is used instead (the vector-extended slot is otherwise nearly idle).
    if use_mxu_conv:
        feat = jnp.dot(wbt, xb, preferred_element_type=jnp.float32) + bb      # (D, TM)
    else:
        feat = jnp.broadcast_to(bb, (D, TM))                                   # hoisted, not per-c
        for c in range(C):                                                     # static unroll, C small
            feat = feat + wbt[:, c:c + 1] * xb[c:c + 1, :]
    feat = jnp.maximum(feat, 0.0)

    # NetVLAD soft-assignment: 1x1 conv D->K on the MXU, softmax over clusters (sublane axis).
    logits = jnp.dot(wat_ref[...], feat,
                     preferred_element_type=jnp.float32) + bat_ref[...]        # (K, TM)
    m = jnp.max(logits, axis=0, keepdims=True)
    e = jnp.exp(logits - m)
    # EUP reciprocal + VPU multiply instead of a divide; approx=False to stay inside 1e-4 tolerance.
    soft = e * pl.reciprocal(jnp.sum(e, axis=0, keepdims=True))                # (K, TM)

    if mask_tail:
        # Zero the soft-assignment of padded spatial columns so they never enter the VLAD sums.
        col = jax.lax.broadcasted_iota(jnp.int32, (1, TM), 1) + i * TM
        soft = jnp.where(col < l_total, soft, 0.0)

    # Lane-dense feature-map writeback (optionally bf16); reshapes straight to NCHW outside.
    layers_ref[0] = feat.astype(layers_ref.dtype)

    # VLAD accumulation in VMEM.  Contraction over TM with feat as lhs so only the small `soft`
    # matrix needs the per-step XLU transpose (rhs), not the (D, TM) feature block.
    acc_ref[...] += jax.lax.dot_general(
        feat, soft, (((1,), (1,)), ((), ())),
        preferred_element_type=jnp.float32)                                    # (D, K)
    asum_ref[...] += jnp.sum(soft, axis=1, keepdims=True)                      # (K, 1)

    @pl.when(i == pl.num_programs(1) - 1)
    def _finalize():
        # Reorient once per sample (cheap) rather than transposing feat every L-step.
        vlad = acc_ref[...].T - cent_ref[...] * asum_ref[...]                  # (K, D)
        # intra-normalization over the feature dim (torch dim=2): x / max(||x||, eps)
        inv1 = jax.lax.rsqrt(jnp.maximum(
            jnp.sum(vlad * vlad, axis=1, keepdims=True), EPS * EPS))
        vlad = vlad * inv1
        # global L2 over the flattened K*D vector (torch dim=1)
        inv2 = jax.lax.rsqrt(jnp.maximum(
            jnp.sum(vlad * vlad, keepdims=True), EPS * EPS))
        vlad_ref[0] = (vlad * inv2).astype(vlad_ref.dtype)


def _plan_tiling(L, C, D, K, layers_itemsize):
    """Generation-aware tile planning.

    Returns (L_pad, TM, vmem_limit_bytes, tensorcores_per_device).  TM is always a multiple of 128
    dividing L_pad, chosen as large as the detected VMEM capacity allows (v5e/v6e 128 MiB, v7x 64 MiB).
    """
    vmem_cap = 64 * 1024 * 1024      # conservative default if detection fails (v7x per-TC size)
    n_cores = 1
    try:
        info = pltpu.get_tpu_info()
        vmem_cap = int(getattr(info, "vmem_capacity_bytes", vmem_cap))
        for attr in ("tensorcore_count", "num_tensorcores", "tensorcores_per_chip",
                     "cores_per_chip"):
            v = getattr(info, attr, None)
            if isinstance(v, int) and v > 0:
                n_cores = v
                break
    except Exception:
        pass

    L_pad = ((L + 127) // 128) * 128

    budget = int(0.6 * vmem_cap)     # leave headroom for weights re-buffering / internal scratch
    # weights + centroids (assume pipeline double-buffers them) + f32 scratch accumulators
    fixed = 2 * 4 * (D * C + D + K * D + K + K * D) + 4 * (D * K + K)

    best = 128
    tm = 128
    while tm <= L_pad:
        if L_pad % tm == 0:
            per_step = (2 * (C * tm * 4 + D * tm * layers_itemsize)   # double-buffered in/out blocks
                        + 4 * tm * (D + 2 * K))                        # feat + logits/soft live values
            if fixed + per_step <= budget:
                best = tm
        tm += 128

    needed = fixed + 2 * (C * best * 4 + D * best * layers_itemsize) + 4 * best * (D + 2 * K)
    # Explicit limit: at least the 32 MiB v6e/v7x scoped default (v5e defaults to only 16 MiB),
    # generously above our own budget, but never close to physical capacity.
    vmem_limit = min(int(0.85 * vmem_cap), max(2 * needed + (8 << 20), 32 << 20))
    return L_pad, best, vmem_limit, n_cores


def embed_net_forward(x, params, layers_dtype=jnp.float32):
    """x: (N, C, H, W) NCHW float32. Returns (returnlayers NCHW feature map, vlad (N, K*D)).

    layers_dtype=jnp.bfloat16 halves the dominant HBM writeback (the D x H x W feature map) if the
    consumer of returnlayers tolerates bf16; default float32 matches the reference semantics.
    """
    N, C, H, W = x.shape
    L = H * W
    D = params["wb"].shape[1]
    K = params["wa"].shape[1]

    L_pad, TM, vmem_limit, n_cores = _plan_tiling(L, C, D, K, jnp.dtype(layers_dtype).itemsize)

    # Pure reshape (no transpose): channels stay on the sublane axis inside the kernel.
    x_rows = x.reshape(N, C, L)
    if L_pad != L:
        x_rows = jnp.pad(x_rows, ((0, 0), (0, 0), (0, L_pad - L)))

    wbt = params["wb"].T          # (D, C)
    bbt = params["bb"].T          # (D, 1)
    wat = params["wa"].T          # (K, D)
    bat = params["ba"].T          # (K, 1)

    use_mxu_conv = D >= 256       # at production D the VPU MAC loop would saturate VALU; MXU is idle
    kernel = functools.partial(_embed_kernel, use_mxu_conv=use_mxu_conv,
                               mask_tail=(L_pad != L), l_total=L)

    # v7x (2 TensorCores per device): shard the batch axis across cores. Single-TC chips keep the
    # previously validated "parallel"/"arbitrary" semantics.
    if n_cores > 1 and hasattr(pltpu, "CORE_PARALLEL") and hasattr(pltpu, "ARBITRARY"):
        dim_sem = (pltpu.CORE_PARALLEL, pltpu.ARBITRARY)
    else:
        dim_sem = ("parallel", "arbitrary")

    layers_flat, vlad = pl.pallas_call(
        kernel,
        out_shape=(jax.ShapeDtypeStruct((N, D, L_pad), layers_dtype),
                   jax.ShapeDtypeStruct((N, K, D), jnp.float32)),
        grid=(N, L_pad // TM),
        in_specs=[
            pl.BlockSpec((1, C, TM), lambda n, i: (n, 0, i)),
            pl.BlockSpec((D, C), lambda n, i: (0, 0)),
            pl.BlockSpec((D, 1), lambda n, i: (0, 0)),
            pl.BlockSpec((K, D), lambda n, i: (0, 0)),
            pl.BlockSpec((K, 1), lambda n, i: (0, 0)),
            pl.BlockSpec((K, D), lambda n, i: (0, 0)),
        ],
        out_specs=(
            pl.BlockSpec((1, D, TM), lambda n, i: (n, 0, i)),
            pl.BlockSpec((1, K, D), lambda n, i: (n, 0, 0)),   # revisited across i; written at last step
        ),
        scratch_shapes=[pltpu.VMEM((D, K), jnp.float32),
                        pltpu.VMEM((K, 1), jnp.float32)],
        compiler_params=pltpu.CompilerParams(
            dimension_semantics=dim_sem,
            vmem_limit_bytes=vmem_limit),
    )(x_rows, wbt, bbt, wat, bat, params["centroids"])

    if L_pad != L:
        layers_flat = layers_flat[:, :, :L]
    returnlayers = layers_flat.reshape(N, D, H, W)   # already NCHW, no transpose needed
    vlad_flat = vlad.reshape(N, K * D)               # .view(N, -1) equivalent
    # TODO(synk): NetVLAD's returnSoft/returnResidual are never consumed by EmbedNet.forward,
    # so they are intentionally not materialized (soft stays in VMEM).
    return returnlayers, vlad_flat


def make_params(key, C_in, D, K):
    k1, k2, k3, k4, k5 = jax.random.split(key, 5)
    return {
        "wb": 0.1 * jax.random.normal(k1, (C_in, D), jnp.float32),
        "bb": 0.1 * jax.random.normal(k2, (1, D), jnp.float32),
        "wa": 0.1 * jax.random.normal(k3, (D, K), jnp.float32),
        "ba": 0.1 * jax.random.normal(k4, (1, K), jnp.float32),
        "centroids": jax.random.normal(k5, (K, D), jnp.float32),
    }


def reference_forward(x, p):
    """Pure-jnp reference mirroring the PyTorch semantics."""
    N, C, H, W = x.shape
    L = H * W
    xf = jnp.transpose(x, (0, 2, 3, 1)).reshape(N * L, C)
    feat = jnp.maximum(xf @ p["wb"] + p["bb"], 0.0)
    soft = jax.nn.softmax(feat @ p["wa"] + p["ba"], axis=-1)
    featb = feat.reshape(N, L, -1)
    softb = soft.reshape(N, L, -1)
    vlad = (jnp.einsum("nlk,nld->nkd", softb, featb)
            - p["centroids"][None] * jnp.sum(softb, axis=1)[..., None])
    vlad = vlad / jnp.maximum(jnp.linalg.norm(vlad, axis=2, keepdims=True), EPS)
    vf = vlad.reshape(N, -1)
    vf = vf / jnp.maximum(jnp.linalg.norm(vf, axis=1, keepdims=True), EPS)
    layers = jnp.transpose(featb.reshape(N, H, W, -1), (0, 3, 1, 2))
    return layers, vf


if __name__ == "__main__":
    N, C_in, H, W = 2, 4, 16, 16   # small shapes consistent with NCHW conv input
    D, K = 32, 8                   # feature dim, number of VLAD clusters

    key = jax.random.PRNGKey(0)
    kx, kp = jax.random.split(key)
    x = jax.random.normal(kx, (N, C_in, H, W), jnp.float32)
    params = make_params(kp, C_in, D, K)

    layers, vlad_x = jax.block_until_ready(embed_net_forward(x, params))
    ref_layers, ref_vlad = reference_forward(x, params)

    assert layers.shape == (N, D, H, W)
    assert vlad_x.shape == (N, K * D)
    assert jnp.allclose(layers, ref_layers, atol=1e-4, rtol=1e-4)
    assert jnp.allclose(vlad_x, ref_vlad, atol=1e-4, rtol=1e-4)

    print("KERNEL_OK")
</pallas_src>

<mosaic_0001>
module attributes {stable_mosaic.version = 11 : i64} {
  func.func @_embed_kernel(%arg0: i32, %arg1: i32, %arg2: memref<1x4x256xf32, #tpu.memory_space<vmem>>, %arg3: memref<32x4xf32, #tpu.memory_space<vmem>>, %arg4: memref<32x1xf32, #tpu.memory_space<vmem>>, %arg5: memref<8x32xf32, #tpu.memory_space<vmem>>, %arg6: memref<8x1xf32, #tpu.memory_space<vmem>>, %arg7: memref<8x32xf32, #tpu.memory_space<vmem>>, %arg8: memref<1x32x256xf32, #tpu.memory_space<vmem>>, %arg9: memref<1x8x32xf32, #tpu.memory_space<vmem>>, %arg10: memref<32x8xf32, #tpu.memory_space<vmem>>, %arg11: memref<8x1xf32, #tpu.memory_space<vmem>>) attributes {dimension_semantics = [#tpu.dimension_semantics<parallel>, #tpu.dimension_semantics<arbitrary>], iteration_bounds = array<i64: 2, 1>, scalar_prefetch = 0 : i64, scratch_operands = 2 : i64, tpu.core_type = #tpu.core_type<tc>, window_params = [{transform_indices = @transform_0, window_bounds = array<i64: 1, 4, 256>}, {pipeline_mode = #tpu.pipeline_mode<synchronous>, transform_indices = @transform_1, window_bounds = array<i64: 32, 4>}, {pipeline_mode = #tpu.pipeline_mode<synchronous>, transform_indices = @transform_2, window_bounds = array<i64: 32, 1>}, {pipeline_mode = #tpu.pipeline_mode<synchronous>, transform_indices = @transform_3, window_bounds = array<i64: 8, 32>}, {pipeline_mode = #tpu.pipeline_mode<synchronous>, transform_indices = @transform_4, window_bounds = array<i64: 8, 1>}, {pipeline_mode = #tpu.pipeline_mode<synchronous>, transform_indices = @transform_5, window_bounds = array<i64: 8, 32>}, {transform_indices = @transform_6, window_bounds = array<i64: 1, 32, 256>}, {transform_indices = @transform_7, window_bounds = array<i64: 1, 8, 32>}]} {
    %c0_i32 = arith.constant 0 : i32
    %0 = arith.cmpi eq, %arg1, %c0_i32 : i32
    %1 = arith.extui %0 : i1 to i32
    %c0_i32_0 = arith.constant 0 : i32
    %2 = arith.cmpi ne, %1, %c0_i32_0 : i32
    scf.if %2 {
      %cst_29 = arith.constant 0.000000e+00 : f32
      %65 = vector.broadcast %cst_29 : f32 to vector<32x8xf32>
      %c0_30 = arith.constant 0 : index
      %c0_31 = arith.constant 0 : index
      %66 = vector.load %arg10[%c0_30, %c0_31] : memref<32x8xf32, #tpu.memory_space<vmem>>, vector<32x8xf32>
      tpu.vector_store %arg10[%c0_30, %c0_31], %65 {strides = array<i32>} : memref<32x8xf32, #tpu.memory_space<vmem>>, vector<32x8xf32>,
      %cst_32 = arith.constant 0.000000e+00 : f32
      %67 = vector.broadcast %cst_32 : f32 to vector<8x1xf32>
      %c0_33 = arith.constant 0 : index
      %c0_34 = arith.constant 0 : index
      %68 = vector.load %arg11[%c0_33, %c0_34] : memref<8x1xf32, #tpu.memory_space<vmem>>, vector<8x1xf32>
      tpu.vector_store %arg11[%c0_33, %c0_34], %67 {strides = array<i32>} : memref<8x1xf32, #tpu.memory_space<vmem>>, vector<8x1xf32>,
    } else {
    }
    %c0 = arith.constant 0 : index
    %c0_1 = arith.constant 0 : index
    %c0_2 = arith.constant 0 : index
    %3 = vector.load %arg2[%c0, %c0_1, %c0_2] : memref<1x4x256xf32, #tpu.memory_space<vmem>>, vector<1x4x256xf32>
    %4 = vector.shape_cast %3 : vector<1x4x256xf32> to vector<4x256xf32>
    %c0_3 = arith.constant 0 : index
    %c0_4 = arith.constant 0 : index
    %5 = vector.load %arg3[%c0_3, %c0_4] : memref<32x4xf32, #tpu.memory_space<vmem>>, vector<32x4xf32>
    %c0_5 = arith.constant 0 : index
    %c0_6 = arith.constant 0 : index
    %6 = vector.load %arg4[%c0_5, %c0_6] : memref<32x1xf32, #tpu.memory_space<vmem>>, vector<32x1xf32>
    %7 = vector.shape_cast %6 : vector<32x1xf32> to vector<32x1xf32>
    %8 = vector.broadcast %7 : vector<32x1xf32> to vector<32x256xf32>
    %9 = vector.extract_strided_slice %5 {offsets = [0, 0], sizes = [32, 1], strides = [1, 1]} : vector<32x4xf32> to vector<32x1xf32>
    %10 = vector.extract_strided_slice %4 {offsets = [0, 0], sizes = [1, 256], strides = [1, 1]} : vector<4x256xf32> to vector<1x256xf32>
    %11 = vector.broadcast %9 : vector<32x1xf32> to vector<32x256xf32>
    %12 = vector.broadcast %10 : vector<1x256xf32> to vector<32x256xf32>
    %13 = arith.mulf %11, %12 : vector<32x256xf32>
    %14 = arith.addf %8, %13 : vector<32x256xf32>
    %15 = vector.extract_strided_slice %5 {offsets = [0, 1], sizes = [32, 1], strides = [1, 1]} : vector<32x4xf32> to vector<32x1xf32>
    %16 = vector.extract_strided_slice %4 {offsets = [1, 0], sizes = [1, 256], strides = [1, 1]} : vector<4x256xf32> to vector<1x256xf32>
    %17 = vector.broadcast %15 : vector<32x1xf32> to vector<32x256xf32>
    %18 = vector.broadcast %16 : vector<1x256xf32> to vector<32x256xf32>
    %19 = arith.mulf %17, %18 : vector<32x256xf32>
    %20 = arith.addf %14, %19 : vector<32x256xf32>
    %21 = vector.extract_strided_slice %5 {offsets = [0, 2], sizes = [32, 1], strides = [1, 1]} : vector<32x4xf32> to vector<32x1xf32>
    %22 = vector.extract_strided_slice %4 {offsets = [2, 0], sizes = [1, 256], strides = [1, 1]} : vector<4x256xf32> to vector<1x256xf32>
    %23 = vector.broadcast %21 : vector<32x1xf32> to vector<32x256xf32>
    %24 = vector.broadcast %22 : vector<1x256xf32> to vector<32x256xf32>
    %25 = arith.mulf %23, %24 : vector<32x256xf32>
    %26 = arith.addf %20, %25 : vector<32x256xf32>
    %27 = vector.extract_strided_slice %5 {offsets = [0, 3], sizes = [32, 1], strides = [1, 1]} : vector<32x4xf32> to vector<32x1xf32>
    %28 = vector.extract_strided_slice %4 {offsets = [3, 0], sizes = [1, 256], strides = [1, 1]} : vector<4x256xf32> to vector<1x256xf32>
    %29 = vector.broadcast %27 : vector<32x1xf32> to vector<32x256xf32>
    %30 = vector.broadcast %28 : vector<1x256xf32> to vector<32x256xf32>
    %31 = arith.mulf %29, %30 : vector<32x256xf32>
    %32 = arith.addf %26, %31 : vector<32x256xf32>
    %cst = arith.constant 0.000000e+00 : f32
    %33 = vector.broadcast %cst : f32 to vector<32x256xf32>
    %34 = arith.maximumf %32, %33 : vector<32x256xf32>
    %c0_7 = arith.constant 0 : index
    %c0_8 = arith.constant 0 : index
    %35 = vector.load %arg5[%c0_7, %c0_8] : memref<8x32xf32, #tpu.memory_space<vmem>>, vector<8x32xf32>
    %cst_9 = arith.constant dense<0.000000e+00> : vector<8x256xf32>
    %36 = tpu.matmul %35, %34, %cst_9 {dimension_numbers = #tpu.dot_dimension_numbers<[1], [0], [0], [1], [0, 0, 1, 1], [], []>} : vector<8x32xf32>, vector<32x256xf32>, vector<8x256xf32> -> vector<8x256xf32>
    %c0_10 = arith.constant 0 : index
    %c0_11 = arith.constant 0 : index
    %37 = vector.load %arg6[%c0_10, %c0_11] : memref<8x1xf32, #tpu.memory_space<vmem>>, vector<8x1xf32>
    %38 = vector.broadcast %37 : vector<8x1xf32> to vector<8x256xf32>
    %39 = arith.addf %36, %38 : vector<8x256xf32>
    %cst_12 = arith.constant dense<0xFF800000> : vector<256xf32>
    %40 = vector.multi_reduction <maximumf>, %39, %cst_12 [0] : vector<8x256xf32> to vector<256xf32>
    %41 = vector.shape_cast %40 : vector<256xf32> to vector<1x256xf32>
    %42 = vector.broadcast %41 : vector<1x256xf32> to vector<8x256xf32>
    %43 = arith.subf %39, %42 : vector<8x256xf32>
    %44 = math.exp %43 : vector<8x256xf32>
    %cst_13 = arith.constant dense<0.000000e+00> : vector<256xf32>
    %45 = vector.multi_reduction <add>, %44, %cst_13 [0] : vector<8x256xf32> to vector<256xf32>
    %46 = vector.shape_cast %45 : vector<256xf32> to vector<1x256xf32>
    %47 = tpu.reciprocal %46 : vector<1x256xf32> -> vector<1x256xf32>
    %48 = vector.broadcast %47 : vector<1x256xf32> to vector<8x256xf32>
    %49 = arith.mulf %44, %48 : vector<8x256xf32>
    %c0_14 = arith.constant 0 : index
    %c0_15 = arith.constant 0 : index
    %c0_16 = arith.constant 0 : index
    %50 = vector.load %arg8[%c0_14, %c0_15, %c0_16] : memref<1x32x256xf32, #tpu.memory_space<vmem>>, vector<1x32x256xf32>
    %51 = vector.shape_cast %50 : vector<1x32x256xf32> to vector<32x256xf32>
    %52 = vector.shape_cast %34 : vector<32x256xf32> to vector<1x32x256xf32>
    tpu.vector_store %arg8[%c0_14, %c0_15, %c0_16], %52 {strides = array<i32>} : memref<1x32x256xf32, #tpu.memory_space<vmem>>, vector<1x32x256xf32>,
    %c0_17 = arith.constant 0 : index
    %c0_18 = arith.constant 0 : index
    %53 = vector.load %arg10[%c0_17, %c0_18] : memref<32x8xf32, #tpu.memory_space<vmem>>, vector<32x8xf32>
    %cst_19 = arith.constant dense<0.000000e+00> : vector<32x8xf32>
    %54 = tpu.matmul %34, %49, %cst_19 {dimension_numbers = #tpu.dot_dimension_numbers<[1], [1], [0], [0], [0, 0, 1, 0], [], []>} : vector<32x256xf32>, vector<8x256xf32>, vector<32x8xf32> -> vector<32x8xf32>
    %55 = arith.addf %53, %54 : vector<32x8xf32>
    %c0_20 = arith.constant 0 : index
    %c0_21 = arith.constant 0 : index
    %56 = vector.load %arg10[%c0_20, %c0_21] : memref<32x8xf32, #tpu.memory_space<vmem>>, vector<32x8xf32>
    tpu.vector_store %arg10[%c0_20, %c0_21], %55 {strides = array<i32>} : memref<32x8xf32, #tpu.memory_space<vmem>>, vector<32x8xf32>,
    %c0_22 = arith.constant 0 : index
    %c0_23 = arith.constant 0 : index
    %57 = vector.load %arg11[%c0_22, %c0_23] : memref<8x1xf32, #tpu.memory_space<vmem>>, vector<8x1xf32>
    %cst_24 = arith.constant dense<0.000000e+00> : vector<8xf32>
    %58 = vector.multi_reduction <add>, %49, %cst_24 [1] : vector<8x256xf32> to vector<8xf32>
    %59 = vector.shape_cast %58 : vector<8xf32> to vector<8x1xf32>
    %60 = arith.addf %57, %59 : vector<8x1xf32>
    %c0_25 = arith.constant 0 : index
    %c0_26 = arith.constant 0 : index
    %61 = vector.load %arg11[%c0_25, %c0_26] : memref<8x1xf32, #tpu.memory_space<vmem>>, vector<8x1xf32>
    tpu.vector_store %arg11[%c0_25, %c0_26], %60 {strides = array<i32>} : memref<8x1xf32, #tpu.memory_space<vmem>>, vector<8x1xf32>,
    %c0_i32_27 = arith.constant 0 : i32
    %62 = arith.cmpi eq, %arg1, %c0_i32_27 : i32
    %63 = arith.extui %62 : i1 to i32
    %c0_i32_28 = arith.constant 0 : i32
    %64 = arith.cmpi ne, %63, %c0_i32_28 : i32
    scf.if %64 {
      %c0_29 = arith.constant 0 : index
      %c0_30 = arith.constant 0 : index
      %65 = vector.load %arg10[%c0_29, %c0_30] : memref<32x8xf32, #tpu.memory_space<vmem>>, vector<32x8xf32>
      %66 = tpu.transpose %65, [1, 0] : vector<32x8xf32> -> vector<8x32xf32>
      %c0_31 = arith.constant 0 : index
      %c0_32 = arith.constant 0 : index
      %67 = vector.load %arg7[%c0_31, %c0_32] : memref<8x32xf32, #tpu.memory_space<vmem>>, vector<8x32xf32>
      %c0_33 = arith.constant 0 : index
      %c0_34 = arith.constant 0 : index
      %68 = vector.load %arg11[%c0_33, %c0_34] : memref<8x1xf32, #tpu.memory_space<vmem>>, vector<8x1xf32>
      %69 = vector.broadcast %68 : vector<8x1xf32> to vector<8x32xf32>
      %70 = arith.mulf %67, %69 : vector<8x32xf32>
      %71 = arith.subf %66, %70 : vector<8x32xf32>
      %72 = arith.mulf %71, %71 : vector<8x32xf32>
      %cst_35 = arith.constant dense<0.000000e+00> : vector<8xf32>
      %73 = vector.multi_reduction <add>, %72, %cst_35 [1] : vector<8x32xf32> to vector<8xf32>
      %74 = vector.shape_cast %73 : vector<8xf32> to vector<8x1xf32>
      %cst_36 = arith.constant 1.000000e-24 : f32
      %75 = vector.broadcast %cst_36 : f32 to vector<8x1xf32>
      %76 = arith.maximumf %74, %75 : vector<8x1xf32>
      %77 = math.rsqrt %76 : vector<8x1xf32>
      %78 = vector.broadcast %77 : vector<8x1xf32> to vector<8x32xf32>
      %79 = arith.mulf %71, %78 : vector<8x32xf32>
      %80 = arith.mulf %79, %79 : vector<8x32xf32>
      %81 = vector.shape_cast %80 : vector<8x32xf32> to vector<1x8x32xf32>
      %cst_37 = arith.constant dense<0.000000e+00> : vector<1xf32>
      %82 = vector.multi_reduction <add>, %81, %cst_37 [1, 2] : vector<1x8x32xf32> to vector<1xf32>
      %83 = vector.shape_cast %82 : vector<1xf32> to vector<1x1x1xf32>
      %84 = vector.extract %83[0, 0, 0] : f32 from vector<1x1x1xf32>
      %85 = vector.broadcast %84 : f32 to vector<1x1xf32>
      %cst_38 = arith.constant 1.000000e-24 : f32
      %86 = vector.broadcast %cst_38 : f32 to vector<1x1xf32>
      %87 = arith.maximumf %85, %86 : vector<1x1xf32>
      %88 = math.rsqrt %87 : vector<1x1xf32>
      %89 = vector.broadcast %88 : vector<1x1xf32> to vector<8x32xf32>
      %90 = arith.mulf %79, %89 : vector<8x32xf32>
      %c0_39 = arith.constant 0 : index
      %c0_40 = arith.constant 0 : index
      %c0_41 = arith.constant 0 : index
      %91 = vector.load %arg9[%c0_39, %c0_40, %c0_41] : memref<1x8x32xf32, #tpu.memory_space<vmem>>, vector<1x8x32xf32>
      %92 = vector.shape_cast %91 : vector<1x8x32xf32> to vector<8x32xf32>
      %93 = vector.shape_cast %90 : vector<8x32xf32> to vector<1x8x32xf32>
      tpu.vector_store %arg9[%c0_39, %c0_40, %c0_41], %93 {strides = array<i32>} : memref<1x8x32xf32, #tpu.memory_space<vmem>>, vector<1x8x32xf32>,
    } else {
    }
    return
  }
  func.func @transform_0(%arg0: i32, %arg1: i32) -> (i32, i32, i32) {
    %c0_i32 = arith.constant 0 : i32
    %c0_i32_0 = arith.constant 0 : i32
    return %arg0, %c0_i32, %arg1 : i32, i32, i32
  }
  func.func @transform_1(%arg0: i32, %arg1: i32) -> (i32, i32) {
    %c0_i32 = arith.constant 0 : i32
    %c0_i32_0 = arith.constant 0 : i32
    %c0_i32_1 = arith.constant 0 : i32
    return %c0_i32, %c0_i32_0 : i32, i32
  }
  func.func @transform_2(%arg0: i32, %arg1: i32) -> (i32, i32) {
    %c0_i32 = arith.constant 0 : i32
    %c0_i32_0 = arith.constant 0 : i32
    %c0_i32_1 = arith.constant 0 : i32
    return %c0_i32, %c0_i32_0 : i32, i32
  }
  func.func @transform_3(%arg0: i32, %arg1: i32) -> (i32, i32) {
    %c0_i32 = arith.constant 0 : i32
    %c0_i32_0 = arith.constant 0 : i32
    %c0_i32_1 = arith.constant 0 : i32
    return %c0_i32, %c0_i32_0 : i32, i32
  }
  func.func @transform_4(%arg0: i32, %arg1: i32) -> (i32, i32) {
    %c0_i32 = arith.constant 0 : i32
    %c0_i32_0 = arith.constant 0 : i32
    %c0_i32_1 = arith.constant 0 : i32
    return %c0_i32, %c0_i32_0 : i32, i32
  }
  func.func @transform_5(%arg0: i32, %arg1: i32) -> (i32, i32) {
    %c0_i32 = arith.constant 0 : i32
    %c0_i32_0 = arith.constant 0 : i32
    %c0_i32_1 = arith.constant 0 : i32
    return %c0_i32, %c0_i32_0 : i32, i32
  }
  func.func @transform_6(%arg0: i32, %arg1: i32) -> (i32, i32, i32) {
    %c0_i32 = arith.constant 0 : i32
    %c0_i32_0 = arith.constant 0 : i32
    return %arg0, %c0_i32, %arg1 : i32, i32, i32
  }
  func.func @transform_7(%arg0: i32, %arg1: i32) -> (i32, i32, i32) {
    %c0_i32 = arith.constant 0 : i32
    %c0_i32_0 = arith.constant 0 : i32
    %c0_i32_1 = arith.constant 0 : i32
    return %arg0, %c0_i32, %c0_i32_0 : i32, i32, i32
  }
}

</mosaic_0001>

<bundles_post_ra>
// kernel: tpu_custom_call.1
= control target key start
LH: loop header
LB: loop body
LE: loop exit
PB: predicated region body
PF: predicated region fallthrough
CT: control target
= control target key end

     0   :  { %13 = vsyncpa [#allocation5], 0  ;;  %s1582_s0 = inlined_call_operand.vmem [shape: f32[2,4,256], index: 0, kind: input, shape index: {}]   ;;  %s1583_s1 = inlined_call_operand.vmem [shape: f32[32,4], index: 1, kind: input, shape index: {}]   ;;  %s1584_s2 = inlined_call_operand.vmem [shape: f32[32,1], index: 2, kind: input, shape index: {}]   ;;  %s1585_s3 = inlined_call_operand.vmem [shape: f32[8,32], index: 3, kind: input, shape index: {}]   ;;  %s1586_s4 = inlined_call_operand.vmem [shape: f32[8,1], index: 4, kind: input, shape index: {}]   ;;  %s1587_s5 = inlined_call_operand.vmem [shape: f32[8,32], index: 5, kind: input, shape index: {}]   ;;  %s1588_s6 = inlined_call_operand.hbm [shape: f32[2,32,256], index: 6, kind: output, shape index: {0}]   ;;  %s1589_s7 = inlined_call_operand.hbm [shape: f32[2,8,32], index: 7, kind: output, shape index: {1}]  }
   0x1   :  { %15 = vsyncpa [#allocation5 + $0x1], 0 }
   0x2   :  { %16 = vsyncpa [#allocation7], 0 }
   0x3   :  { %18 = vsyncpa [#allocation7 + $0x1], 0  ;;  %s1294_s24 = smov 0   ;;  %s1296_s25 = smov 0  }
   0x4   :  { %s1298_s26 = smov 0   ;;  %s1300_s27 = smov 0  }
   0x5   :  { %s1302_s28 = smov 0   ;;  %s1304_s29 = smov 0  }
   0x6 LB: > { %s1017_s30 = sadd.s32 4294967295, %s1243_s29   ;;  %s1018_s8 = sadd.s32 4294967294, %s1243_s29   ;;  %s1243_s29 = sphi %s1304_s29, %s24_s29   ;;  %s1239_s28 = sphi %s1302_s28, %s1596_s28   ;;  %s1235_s27 = sphi %s1300_s27, %s1595_s27   ;;  %s1231_s26 = sphi %s1298_s26, %s1594_s26   ;;  %s1227_s25 = sphi %s1296_s25, %s1593_s25   ;;  %s1223_s24 = sphi %s1294_s24, %s1592_s24  }
   0x7   : > { %s36_s9 = sadd.s32 1, %s1239_s28  ;;  %s178_s10 = sadd.s32 1, %s1231_s26 }
   0x8   : > { %p38_p0 = scmp.ge.s32.totalorder %s36_s9, 2  ;;  %p188_p1 = scmp.ne.s32.totalorder %s1231_s26, %s1227_s25 }
   0x9   : > { %p189_p2 = scmp.eq.s32.totalorder %s1017_s30, 1  ;;  %p194_p3 = scmp.ne.s32.totalorder %s1227_s25, %s1223_s24 }
   0xa   : > { %s1598_s9 = smov (%p38_p0, %s36_s9), 0  ;;  %p195_p5 = scmp.eq.s32.totalorder %s1018_s8, 1 }
   0xb   : > { %p1334_p4 = por %p189_p2, %p188_p1  ;;  %s173_s12 = ssub.s32 %s1239_s28, %s1598_s9 }
   0xc   : > { %p1021_p6 = scmp.ge.s32.totalorder %s1243_s29, 1  ;;  %p176_p7 = scmp.eq.s32.totalorder %s173_s12, 0 }
   0xd   : > { %p1341_p8 = por %p195_p5, %p194_p3  ;;  %p267_p9 = scmp.lt.s32.totalorder %s1243_s29, 3 }
   0xe   : > { %s1347_s14 = scalar_select %p176_p7, %s1231_s26, %s178_s10  }
   0xf   : > { %p268_p10 = pnand %p1021_p6, %p267_p9 }
  0x10   : > { %p309_p11 = scmp.lt.s32.totalorder (!%p268_p10), %s1235_s27, 1  ;;  %s1415_s8 = sand.u32 (!%p268_p10), 1, %s1227_s25  }
  0x11   : > { %271 = sbr.rel (%p268_p10) target bundleno = 1194 (0x4aa), region = 44  ;;  %s1022_s10 = sshll.u32 (!%p268_p10), %s1415_s8, 6 }
  0x12   : > { %s1431_s12 = scalar_lea.vmem (!%p268_p10), [#allocation4], %s1022_s10  ;;  %s1035_s19 = sshll.u32 (!%p268_p10), %s1235_s27, 10 }
  0x13   : > { %s1514_s23 = scalar_lea.hbm (!%p268_p10), %s1588_s6, %s1035_s19  ;;  %s1250_s15 = smov (!%p268_p10), [#allocation4]  }
  0x14   : > { %s1141_s16 = sshll.u32 (!%p268_p10), %s1250_s15, 4  ;;  %s1142_s16 = int_to_ptr.vmem [resolvable:$false] %s1141_s16 }
  0x16   : > { %v333_v0 = vld [vmem:[%s1583_s1 + $0x10] sm:$0xff]  ;;  %v1245_v1 = vmov 1   ;;  %v1246_v2 = vmov 0   ;;  %v334_v3 = vld [vmem:[%s1583_s1 + $0x18] sm:$0xff]  ;;  %v332_v5 = vld [vmem:[%s1583_s1 + $0x8] sm:$0xff]  ;;  %v1247_v7 = vmov 2   ;;  %v380_v14 = vlaneseq }
  0x17   : > { %1110 = vset.pattern.permute.xlu0 %v1245_v1  ;;  %1107 = vset.pattern.permute.xlu1 %v1246_v2  ;;  %v338_v4 = vld [vmem:[%s1584_s2 + $0x18] sm:$0xff]  ;;  %v337_v6 = vld [vmem:[%s1584_s2 + $0x10] sm:$0xff]  ;;  %v331_v8 = vld [vmem:[%s1583_s1] sm:$0xff]  ;;  %v1248_v10 = vmov 3   ;;  %v1249_v12 = vmov 0.0   ;;  %s310_s20 = scalar_select %p309_p11, %s1235_s27, 1 }
  0x18   : > { %423 = vperm.xlu0 %1110, %v333_v0   ;;  %371 = vperm.xlu1 %1107, %v333_v0   ;;  %v336_v9 = vld [vmem:[%s1584_s2 + $0x8] sm:$0xff]  ;;  %v335_v11 = vld [vmem:[%s1584_s2] sm:$0xff]  ;;  %v381_v17 = vshrl.u32 %v380_v14, 7  ;;  %vm579_vm0 = vcmask 261120   ;;  %vm328_vm1 = vcmask 7168   ;;  %vm323_vm2 = vcmask 64512  }
  0x19   : > { %647 = vmatprep.mubr.f32.mxu0 %v1249_v12  ;;  %v573_v13 = vld [vmem:[%s1586_s4] sm:$0xff]  ;;  %s1034_s21 = sshll.u32 %s310_s20, 3  ;;  %329 = vst.msk [vmem:[#allocation3] sm:$0xff] %vm328_vm1, %v1249_v12  ;;  %s893_s20 = sshll.u32 %s1431_s12, 4  ;;  %s1516_s20 = int_to_ptr.vmem [resolvable:$true] %s893_s20 }
  0x1a   : > { %s316_s30 = scalar_lea.vmem %s1582_s0, %s1034_s21  ;;  %v382_v20 = vsub.s32 0, %v381_v17  ;;  %v386_v21 = vsub.s32 4, %v381_v17  ;;  %v432_v24 = vsub.s32 1, %v381_v17  ;;  %v436_v25 = vsub.s32 5, %v381_v17  ;;  %324 = vst.msk [vmem:[#allocation2] sm:$0xff] %vm323_vm2, %v1249_v12  ;;  %325 = vst.msk [vmem:[#allocation2 + $0x8] sm:$0xff] %vm323_vm2, %v1249_v12  ;;  %p1144_p1 = scmp.lt.s32.totalorder %s1516_s20, %s1142_s16 }
  0x1b   : > { %v330_v22 = vld [vmem:[%s316_s30] sm:$0xff]  ;;  %v482_v29 = vsub.s32 2, %v381_v17  ;;  %v486_v30 = vsub.s32 6, %v381_v17  ;;  %v532_v39 = vsub.s32 3, %v381_v17  ;;  %v536_v40 = vsub.s32 7, %v381_v17  ;;  %326 = vst.msk [vmem:[#allocation2 + $0x10] sm:$0xff] %vm323_vm2, %v1249_v12 }
  0x1c   : > { %1111 = vset.pattern.permute.xlu0 %v1246_v2  ;;  %1108 = vset.pattern.permute.xlu1 %v1245_v1  ;;  %v383_v27 = vrot.slane %v330_v22, %v382_v20  ;;  %v387_v28 = vrot.slane %v330_v22, %v386_v21  ;;  %v433_v32 = vrot.slane %v330_v22, %v432_v24  ;;  %s873_s30 = scalar_lea.sflag [#allocation5], %s1415_s8  ;;  %s1137_s10 = scalar_lea.vmem %s1516_s20, 1024 }
  0x1d   : > { %376 = vperm.xlu0 %1111, %v334_v3   ;;  %427 = vperm.xlu1 %1108, %v334_v3   ;;  %v437_v33 = vrot.slane %v330_v22, %v436_v25  ;;  %v483_v37 = vrot.slane %v330_v22, %v482_v29  ;;  %v487_v38 = vrot.slane %v330_v22, %v486_v30  ;;  %p1138_p12 = scmp.ne.s32.totalorder %s1516_s20, %s1137_s10 }
  0x1e   : > { %v1388_v34 = vrot.slane %v383_v27, %v382_v20  ;;  %v1390_v35 = vrot.slane %v387_v28, %v382_v20  ;;  %v1396_v44 = vrot.slane %v433_v32, %v432_v24  ;;  %v533_v49 = vrot.slane %v330_v22, %v532_v39  ;;  %327 = vst.msk [vmem:[#allocation2 + $0x18] sm:$0xff] %vm323_vm2, %v1249_v12 }
  0x1f   : > { %v1398_v45 = vrot.slane %v437_v33, %v432_v24  ;;  %v1400_v46 = vrot.slane %v483_v37, %v482_v29  ;;  %v1402_v47 = vrot.slane %v487_v38, %v482_v29  ;;  %v537_v50 = vrot.slane %v330_v22, %v536_v40  ;;  %p1139_p13 = pnand %p1138_p12, %p1334_p4 }
  0x20   : > { %v1410_v60 = vrot.slane %v533_v49, %v532_v39 }
  0x21   : > { %356 = vperm.xlu0 %1111, %v338_v4   ;;  %1109 = vset.pattern.permute.xlu1 %v1246_v2  ;;  %v1412_v61 = vrot.slane %v537_v50, %v532_v39  ;;  %p1140_p0 = pneg %p1139_p13 }
  0x22   : > { %366 = vperm.xlu1 %1109, %v332_v5  }
  0x25   : > { %351 = vperm.xlu0 %1111, %v337_v6  }
  0x26   : > { %1112 = vset.pattern.permute.xlu1 %v1247_v7 }
  0x27   : > { %477 = vperm.xlu1 %1112, %v334_v3  }
  0x29   : > { %361 = vperm.xlu0 %1111, %v331_v8  }
  0x2b   : > { %1113 = vset.pattern.permute.xlu1 %v1246_v2 }
  0x2c   : > { %346 = vperm.xlu1 %1113, %v336_v9  }
  0x2d   : > { %1118 = vset.pattern.permute.xlu0 %v1247_v7 }
  0x2e   : > { %469 = vperm.xlu0 %1118, %v332_v5  }
  0x30   : > { %1114 = vset.pattern.permute.xlu1 %v1245_v1 }
  0x31   : > { %419 = vperm.xlu1 %1114, %v332_v5  }
  0x32   : > { %1119 = vset.pattern.permute.xlu0 %v1248_v10 }
  0x33   : > { %527 = vperm.xlu0 %1119, %v334_v3  }
  0x35   : > { %1115 = vset.pattern.permute.xlu1 %v1247_v7 }
  0x36   : > { %473 = vperm.xlu1 %1115, %v333_v0  }
  0x37   : > { %519 = vperm.xlu0 %1119, %v332_v5  }
  0x3a   : > { %1116 = vset.pattern.permute.xlu1 %v1246_v2 }
  0x3b   : > { %341 = vperm.xlu1 %1116, %v335_v11   ;;  %1124 = vset.pattern.permute.xlu0 %v1246_v2 }
  0x3f   : > { %1117 = vset.pattern.permute.xlu1 %v1245_v1 }
  0x40   : > { %415 = vperm.xlu1 %1117, %v331_v8  }
  0x44   : > { %1120 = vset.pattern.permute.xlu1 %v1248_v10 }
  0x45   : > { %523 = vperm.xlu1 %1120, %v333_v0  }
  0x49   : > { %1121 = vset.pattern.permute.xlu1 %v1247_v7 }
  0x4a   : > { %465 = vperm.xlu1 %1121, %v331_v8  }
  0x4e   : > { %1122 = vset.pattern.permute.xlu1 %v1248_v10 }
  0x4f   : > { %515 = vperm.xlu1 %1122, %v331_v8  }
  0x53   : > { %1123 = vset.pattern.permute.xlu1 %v1246_v2 }
  0x54   : > { %576 = vperm.xlu1 %1123, %v573_v13  }
  0x93   : > { %v1379_v15 = vpop.permute.xlu1 %371  ;;  %v1381_v16 = vpop.permute.xlu0 %423 }
  0x94   : > { %v402_v33 = vmul.f32 %v1388_v34, %v1379_v15  ;;  %v452_v37 = vmul.f32 %v1396_v44, %v1381_v16  ;;  %v453_v38 = vmul.f32 %v1398_v45, %v1381_v16 }
  0x98   : > { %v377_v18 = vpop.permute.xlu0 %376  ;;  %v428_v19 = vpop.permute.xlu1 %427 }
  0x99   : > { %v404_v41 = vmul.f32 %v1388_v34, %v377_v18  ;;  %v405_v42 = vmul.f32 %v1390_v35, %v377_v18  ;;  %v454_v54 = vmul.f32 %v1396_v44, %v428_v19  ;;  %v455_v55 = vmul.f32 %v1398_v45, %v428_v19 }
  0x9c   : > { %v357_v23 = vpop.permute.xlu0 %356 }
  0x9d   : > { %v367_v26 = vpop.permute.xlu1 %366  ;;  %v412_v51 = vadd.f32 %v404_v41, %v357_v23  ;;  %v413_v52 = vadd.f32 %v405_v42, %v357_v23 }
  0x9e   : > { %v400_v58 = vmul.f32 %v1388_v34, %v367_v26  ;;  %v401_v59 = vmul.f32 %v1390_v35, %v367_v26 }
  0x9f   : > { %v462_v62 = vadd.f32 %v454_v54, %v412_v51  ;;  %v463_v63 = vadd.f32 %v455_v55, %v413_v52 }
  0xa0   : > { %v1386_v31 = vpop.permute.xlu0 %351 }
  0xa1   : > { %v410_v39 = vadd.f32 %v402_v33, %v1386_v31 }
  0xa2   : > { %v478_v36 = vpop.permute.xlu1 %477 }
  0xa3   : > { %v504_v56 = vmul.f32 %v1400_v46, %v478_v36  ;;  %v505_v57 = vmul.f32 %v1402_v47, %v478_v36  ;;  %v403_v36 = vmul.f32 %v1390_v35, %v1379_v15  ;;  %v460_v15 = vadd.f32 %v452_v37, %v410_v39 }
  0xa4   : > { %v1394_v43 = vpop.permute.xlu0 %361 }
  0xa5   : > { %v512_v5 = vadd.f32 %v504_v56, %v462_v62  ;;  %v513_v6 = vadd.f32 %v505_v57, %v463_v63  ;;  %v411_v40 = vadd.f32 %v403_v36, %v1386_v31  ;;  %v398_v31 = vmul.f32 %v1388_v34, %v1394_v43 }
  0xa6   : > { %v399_v56 = vmul.f32 %v1390_v35, %v1394_v43 }
  0xa7   : > { %v347_v48 = vpop.permute.xlu1 %346  ;;  %v461_v49 = vadd.f32 %v453_v38, %v411_v40 }
  0xa8   : > { %v408_v1 = vadd.f32 %v400_v58, %v347_v48  ;;  %v409_v2 = vadd.f32 %v401_v59, %v347_v48 }
  0xa9   : > { %v470_v53 = vpop.permute.xlu0 %469 }
  0xaa   : > { %v500_v7 = vmul.f32 %v1400_v46, %v470_v53  ;;  %v501_v8 = vmul.f32 %v1402_v47, %v470_v53 }
  0xac   : > { %v420_v0 = vpop.permute.xlu1 %419 }
  0xad   : > { %v450_v3 = vmul.f32 %v1396_v44, %v420_v0  ;;  %v451_v4 = vmul.f32 %v1398_v45, %v420_v0 }
  0xae   : > { %v528_v9 = vpop.permute.xlu0 %527 }
  0xaf   : > { %v458_v10 = vadd.f32 %v450_v3, %v408_v1  ;;  %v459_v11 = vadd.f32 %v451_v4, %v409_v2  ;;  %v554_v13 = vmul.f32 %v1410_v60, %v528_v9  ;;  %v555_v14 = vmul.f32 %v1412_v61, %v528_v9 }
  0xb1   : > { %v562_v17 = vadd.f32 %v554_v13, %v512_v5  ;;  %v563_v18 = vadd.f32 %v555_v14, %v513_v6  ;;  %v474_v19 = vpop.permute.xlu1 %473  ;;  %v508_v21 = vadd.f32 %v500_v7, %v458_v10  ;;  %v509_v22 = vadd.f32 %v501_v8, %v459_v11  ;;  %v572_v8 = vld [vmem:[%s1585_s3] sm:$0xff] }
  0xb2   : > { %v520_v20 = vpop.permute.xlu0 %519  ;;  %v502_v42 = vmul.f32 %v1400_v46, %v474_v19  ;;  %v503_v48 = vmul.f32 %v1402_v47, %v474_v19 }
  0xb3   : > { %v550_v23 = vmul.f32 %v1410_v60, %v520_v20  ;;  %v551_v24 = vmul.f32 %v1412_v61, %v520_v20  ;;  %v1426_v25 = vmax.f32 %v563_v18, 0.0  ;;  %v1428_v26 = vmax.f32 %v562_v17, 0.0 }
  0xb4   : > { %v510_v51 = vadd.f32 %v502_v42, %v460_v15  ;;  %v511_v52 = vadd.f32 %v503_v48, %v461_v49 }
  0xb5   : > { %v558_v27 = vadd.f32 %v550_v23, %v508_v21  ;;  %v559_v28 = vadd.f32 %v551_v24, %v509_v22  ;;  %607 = vmatprep.subr.mxu0 %v1426_v25  ;;  %695 = vst [vmem:[%s1431_s12 + $0x38] sm:$0xff] %v1426_v25  ;;  %694 = vst [vmem:[%s1431_s12 + $0x30] sm:$0xff] %v1428_v26 }
  0xb6   : > { %v342_v29 = vpop.permute.xlu1 %341  ;;  %608 = vmatpush1.msra.mxu0 %v1428_v26 }
  0xb7   : > { %v567_v30 = vmax.f32 %v559_v28, 0.0  ;;  %v1438_v32 = vmax.f32 %v558_v27, 0.0  ;;  %v406_v0 = vadd.f32 %v398_v31, %v342_v29  ;;  %v407_v1 = vadd.f32 %v399_v56, %v342_v29 }
  0xb9   : > { %691 = vst [vmem:[%s1431_s12 + $0x18] sm:$0xff] %v567_v30  ;;  %769 = vmatprep.mubr.f32.mxu1 %v567_v30  ;;  %690 = vst [vmem:[%s1431_s12 + $0x10] sm:$0xff] %v1438_v32 }
  0xbb   : > { %v416_v41 = vpop.permute.xlu1 %415 }
  0xbc   : > { %v448_v57 = vmul.f32 %v1396_v44, %v416_v41  ;;  %v449_v58 = vmul.f32 %v1398_v45, %v416_v41 }
  0xbe   : > { %v456_v34 = vadd.f32 %v448_v57, %v406_v0  ;;  %v457_v35 = vadd.f32 %v449_v58, %v407_v1 }
  0xc0   : > { %v524_v50 = vpop.permute.xlu1 %523 }
  0xc1   : > { %v552_v53 = vmul.f32 %v1410_v60, %v524_v50  ;;  %v553_v54 = vmul.f32 %v1412_v61, %v524_v50 }
  0xc3   : > { %v560_v16 = vadd.f32 %v552_v53, %v510_v51  ;;  %v561_v55 = vadd.f32 %v553_v54, %v511_v52 }
  0xc5   : > { %v466_v59 = vpop.permute.xlu1 %465  ;;  %v1463_v62 = vmax.f32 %v561_v55, 0.0  ;;  %v1465_v63 = vmax.f32 %v560_v16, 0.0 }
  0xc6   : > { %v498_v2 = vmul.f32 %v1400_v46, %v466_v59  ;;  %v499_v3 = vmul.f32 %v1402_v47, %v466_v59 }
  0xc7   : > { %609 = vmatprep.subr.mxu0 %v1463_v62  ;;  %693 = vst [vmem:[%s1431_s12 + $0x28] sm:$0xff] %v1463_v62  ;;  %692 = vst [vmem:[%s1431_s12 + $0x20] sm:$0xff] %v1465_v63 }
  0xc8   : > { %610 = vmatpush1.msra.mxu0 %v1465_v63  ;;  %v506_v44 = vadd.f32 %v498_v2, %v456_v34  ;;  %v507_v45 = vadd.f32 %v499_v3, %v457_v35  ;;  %v698_v35 = vld [vmem:[#allocation2 + $0x10] sm:$0xff] }
  0xc9   : > { %611 = vmatprep.subr.mxu0 %v567_v30 }
  0xca   : > { %v516_v43 = vpop.permute.xlu1 %515  ;;  %612 = vmatpush1.msra.mxu0 %v1438_v32 }
  0xcb   : > { %v548_v46 = vmul.f32 %v1410_v60, %v516_v43  ;;  %v549_v47 = vmul.f32 %v1412_v61, %v516_v43 }
  0xcd   : > { %v556_v4 = vadd.f32 %v548_v46, %v506_v44  ;;  %v557_v5 = vadd.f32 %v549_v47, %v507_v45  ;;  %v699_v45 = vld [vmem:[#allocation2 + $0x18] sm:$0xff] }
  0xcf   : > { %v565_v6 = vmax.f32 %v557_v5, 0.0  ;;  %v564_v7 = vmax.f32 %v556_v4, 0.0  ;;  %v577_v60 = vpop.permute.xlu1 %576 }
  0xd1   : > { %613 = vmatprep.subr.mxu0 %v565_v6  ;;  %689 = vst [vmem:[%s1431_s12 + $0x8] sm:$0xff] %v565_v6  ;;  %688 = vst [vmem:[%s1431_s12] sm:$0xff] %v564_v7  ;;  %s1143_s12 = scalar_lea.vmem %s1142_s16, 2048 }
  0xd2   : > { %614 = vmatpush1.msra.mxu0 %v564_v7  ;;  %p1145_p2 = scmp.lt.s32.totalorder %s1143_s12, %s1137_s10 }
  0xd3   : > { %1026 = vmatmul.mubr.msk.f32.vlgmr.msra.gmra.mxu0 %vm579_vm0, %v572_v8 }
  0xd4   : > { %764 = vmatprep.mubr.f32.mxu0 %v565_v6  ;;  %p1146_p3 = por %p1145_p2, %p1144_p1 }
  0xd6   : > { %p1147_p5 = pnand %p1146_p3, %p1140_p0 }
 0x193   : > { %v649_v61 = vpop.f32.mrf.mxu0 }
 0x194   : > { %v650_v9 = vadd.f32 %v649_v61, %v577_v60 }
 0x195   : > { %v651_v10 = vpop.f32.mrf.mxu0 }
 0x196   : > { %v654_v11 = vrot.slane %v650_v9, 4  ;;  %v652_v13 = vadd.f32 %v651_v10, %v577_v60  ;;  %v840_v60 = vld [vmem:[%s1587_s5] sm:$0xff] }
 0x198   : > { %v655_v14 = vmax.f32 %v650_v9, %v654_v11  ;;  %v660_v17 = vrot.slane %v652_v13, 4 }
 0x19a   : > { %v656_v18 = vrot.slane %v655_v14, 2  ;;  %v661_v19 = vmax.f32 %v652_v13, %v660_v17 }
 0x19c   : > { %v657_v20 = vmax.f32 %v655_v14, %v656_v18  ;;  %v662_v21 = vrot.slane %v661_v19, 2 }
 0x19e   : > { %v658_v22 = vrot.slane %v657_v20, 1  ;;  %v663_v23 = vmax.f32 %v661_v19, %v662_v21 }
 0x1a0   : > { %v659_v24 = vmax.f32 %v657_v20, %v658_v22  ;;  %v664_v27 = vrot.slane %v663_v23, 1 }
 0x1a2   : > { %v666_v28 = vsub.f32 %v650_v9, %v659_v24  ;;  %v665_v29 = vmax.f32 %v663_v23, %v664_v27 }
 0x1a4   : > { %v668_v30 = vmul.f32 1.442695, %v666_v28  ;;  %v667_v33 = vsub.f32 %v652_v13, %v665_v29 }
 0x1a6   : > { %1125 = vpow2.f32 %v668_v30  ;;  %v670_v36 = vmul.f32 1.442695, %v667_v33 }
 0x1a8   : > { %1127 = vpow2.f32 %v670_v36 }
 0x1b3   : > { %v1126_v37 = vpop.eup %1125 }
 0x1b4   : > { %v672_v38 = vrot.slane %v1126_v37, 4 }
 0x1b5   : > { %v1128_v39 = vpop.eup %1127 }
 0x1b6   : > { %v678_v40 = vrot.slane %v1128_v39, 4  ;;  %v673_v41 = vadd.f32 %v1126_v37, %v672_v38 }
 0x1b8   : > { %v679_v42 = vadd.f32 %v1128_v39, %v678_v40  ;;  %v674_v48 = vrot.slane %v673_v41, 2 }
 0x1ba   : > { %v680_v15 = vrot.slane %v679_v42, 2  ;;  %v675_v49 = vadd.f32 %v674_v48, %v673_v41 }
 0x1bc   : > { %v681_v50 = vadd.f32 %v680_v15, %v679_v42  ;;  %v676_v51 = vrot.slane %v675_v49, 1 }
 0x1be   : > { %v682_v52 = vrot.slane %v681_v50, 1  ;;  %v677_v53 = vadd.f32 %v676_v51, %v675_v49 }
 0x1c0   : > { %v683_v54 = vadd.f32 %v682_v52, %v681_v50  ;;  %1129 = vrcp.f32 %v677_v53 }
 0x1c2   : > { %1131 = vrcp.f32 %v683_v54 }
 0x1cd   : > { %v1130_v16 = vpop.eup %1129 }
 0x1ce   : > { %v686_v56 = vmul.f32 %v1130_v16, %v1126_v37 }
 0x1cf   : > { %v1132_v55 = vpop.eup %1131 }
 0x1d0   : > { %v687_v31 = vmul.f32 %v1132_v55, %v1128_v39 }
 0x1d2   : > { %730 = vmatprep.subr.mxu0 %v687_v31  ;;  %1036 = vmatprep.subr.mxu1 %v687_v31  ;;  %v795_v57 = vadd.f32 %v687_v31, %v686_v56 }
 0x1d3   : > { %731 = vmatpush1.xpose.msra.mxu0 %v686_v56  ;;  %1037 = vmatpush1.xpose.msra.mxu1 %v686_v56 }
 0x1d4   : > { %796 = vadd.xlane.f32.xlu0 %v795_v57 }
 0x1d6   : > { %765 = vmatmul.mubr.f32.vlgmr.msra.gmra.mxu0 %v564_v7  ;;  %770 = vmatmul.mubr.f32.vlgmr.msra.gmra.mxu1 %v1438_v32  ;;  %v794_v32 = vld [vmem:[#allocation3] sm:$0xff] }
 0x1d7   : > { %774 = vmatprep.mubr.f32.mxu1 %v1463_v62  ;;  %v697_v62 = vld [vmem:[#allocation2 + $0x8] sm:$0xff] }
 0x1da   : > { %775 = vmatmul.mubr.f32.gmra.mxu1 %v1465_v63 }
 0x1db   : > { %779 = vmatprep.mubr.f32.mxu1 %v1426_v25 }
 0x1de   : > { %780 = vmatmul.mubr.f32.gmra.mxu1 %v1428_v26  ;;  %v696_v26 = vld [vmem:[#allocation2] sm:$0xff] }
 0x25d   : > { %v797_v58 = vpop.xlane.xlu0 %796 }
 0x25e   : > { %v798_v59 = vadd.f32 %v797_v58, %v794_v32 }
 0x260   : > { %800 = vst.msk [vmem:[#allocation3] sm:$0xff] %vm328_vm1, %v798_v59 }
 0x267   : > { %v841_v25 = vld [vmem:[#allocation3] sm:$0xff] }
 0x268   : > { %844 = vperm.xlu1 %1123, %v841_v25  }
 0x296   : > { %v766_v63 = vpop.f32.mrf.mxu0  ;;  %v771_v0 = vpop.f32.mrf.mxu1 }
 0x297   : > { %v785_v1 = vadd.f32 %v766_v63, %v696_v26  ;;  %v786_v2 = vadd.f32 %v771_v0, %v697_v62 }
 0x298   : > { %v768_v3 = vpop.f32.mrf.mxu0  ;;  %v773_v34 = vpop.f32.mrf.mxu1 }
 0x299   : > { %790 = vst.msk [vmem:[#allocation2] sm:$0xff] %vm323_vm2, %v785_v1  ;;  %791 = vst.msk [vmem:[#allocation2 + $0x8] sm:$0xff] %vm323_vm2, %v786_v2 }
 0x29a   : > { %v776_v12 = vpop.f32.mrf.mxu1 }
 0x29b   : > { %v787_v43 = vadd.f32 %v776_v12, %v698_v35 }
 0x29c   : > { %v778_v44 = vpop.f32.mrf.mxu1 }
 0x29d   : > { %792 = vst.msk [vmem:[#allocation2 + $0x10] sm:$0xff] %vm323_vm2, %v787_v43 }
 0x29e   : > { %v781_v46 = vpop.f32.mrf.mxu1 }
 0x29f   : > { %v788_v47 = vadd.f32 %v781_v46, %v699_v45 }
 0x2a0   : > { %v783_v4 = vpop.f32.mrf.mxu1  ;;  %v804_v5 = vld [vmem:[#allocation2] sm:$0xff]  ;;  %v805_v6 = vld [vmem:[#allocation2 + $0x8] sm:$0xff] }
 0x2a1   : > { %793 = vst.msk [vmem:[#allocation2 + $0x18] sm:$0xff] %vm323_vm2, %v788_v47  ;;  %808 = vxpose.xlu1.b32.start [1/4] (short) (narrow) %v804_v5, 8 }
 0x2a4   : > { %v806_v7 = vld [vmem:[#allocation2 + $0x10] sm:$0xff] }
 0x2a5   : > { %809 = vxpose.xlu1.b32.cont [2/4] (short) (narrow) %v805_v6, 8 }
 0x2a8   : > { %v807_v8 = vld [vmem:[#allocation2 + $0x18] sm:$0xff] }
 0x2a9   : > { %810 = vxpose.xlu1.b32.cont [3/4] (short) (narrow) %v806_v7, 8 }
 0x2ad   : > { %811 = vxpose.xlu1.b32.end [4/4] (short) (narrow) %v807_v8, 8 }
 0x2e3   : > { %v845_v61 = vpop.permute.xlu1 %844 }
 0x2e4   : > { %v847_v9 = vmul.f32 %v845_v61, %v840_v60 }
 0x31d   : > { %v824_v10 = vpop.trf.xlu1 }
 0x31e   : > { %v848_v11 = vsub.f32 %v824_v10, %v847_v9 }
 0x320   : > { %v849_v13 = vmul.f32 %v848_v11, %v848_v11 }
 0x322   : > { %v850_v14 = vsel %vm579_vm0, %v849_v13, 0.0 }
 0x323   : > { %851 = vadd.xlane.f32.xlu0 %v850_v14 }
 0x3ac   : > { %v852_v17 = vpop.xlane.xlu0 %851 }
 0x3ad   : > { %v853_v18 = vmax.f32 %v852_v17, 1e-24 }
 0x3af   : > { %1133 = vrsqrt.f32 %v853_v18 }
 0x3bc   : > { %v1134_v19 = vpop.eup %1133 }
 0x3bd   : > { %v855_v20 = vmul.f32 %v1134_v19, %v848_v11 }
 0x3bf   : > { %v856_v21 = vmul.f32 %v855_v20, %v855_v20 }
 0x3c1   : > { %v857_v22 = vsel %vm579_vm0, %v856_v21, 0.0 }
 0x3c2   : > { %858 = vadd.xlane.f32.xlu0 %v857_v22 }
 0x3c3   : > { %1150 = shalt.err (!%p1147_p5)
}
 0x3c4   : > { %s1151_s17 = scalar_lea.hbm %s1514_s23, 1024  ;;  %s1155_s21 = scalar_lea.hbm %s1588_s6, 2048 }
 0x3c5   : > { %p1152_p6 = scmp.ne.s32.totalorder %s1514_s23, %s1151_s17  ;;  %p1156_p10 = scmp.lt.s32.totalorder %s1514_s23, %s1588_s6 }
 0x3c6   : > { %p1157_p11 = scmp.lt.s32.totalorder %s1155_s21, %s1151_s17 }
 0x3c7   : > { %p1153_p7 = pnand %p1152_p6, %p1334_p4 }
 0x3c8   : > { %p1158_p12 = por %p1157_p11, %p1156_p10 }
 0x3c9   : > { %p1154_p9 = pneg %p1153_p7 }
 0x3cb   : > { %p1159_p13 = pnand %p1158_p12, %p1154_p9 }
 0x3cd   : > { %1162 = shalt.err (!%p1159_p13)
}
 0x3ce   : > { %s1251_s10 = smov 256   ;;  %s1252_s16 = smov 16  }
 0x3cf   : > { %1040 = dma.vmem_to_hbm [thread:$0]  (%p1334_p4), %s1516_s20, 1024, %s1514_s23, %s873_s30, %s1251_s10, %s1251_s10, %s1252_s16  }
 0x3d0   : > { %s1023_s17 = sshll.u32 %s1415_s8, 3  ;;  %s1031_s18 = sshll.u32 %s1235_s27, 7 }
 0x3d1   : > { %s307_s19 = scalar_lea.vmem [#allocation6], %s1023_s17  ;;  %s907_s30 = scalar_lea.hbm %s1589_s7, %s1031_s18 }
 0x3d2   : > { %s909_s21 = sshll.u32 %s307_s19, 4  ;;  %s878_s22 = scalar_lea.sflag [#allocation7], %s1415_s8  ;;  %s910_s21 = int_to_ptr.vmem [resolvable:$true] %s909_s21 }
 0x3d3   : > { %s1163_s15 = scalar_lea.vmem %s910_s21, 128  ;;  %s1253_s10 = smov [#allocation6]  }
 0x3d4   : > { %p1164_p0 = scmp.ne.s32.totalorder %s910_s21, %s1163_s15  ;;  %s1167_s16 = sshll.u32 %s1253_s10, 4  ;;  %s1168_s16 = int_to_ptr.vmem [resolvable:$false] %s1167_s16 }
 0x3d5   : > { %s1169_s27 = scalar_lea.vmem %s1168_s16, 256  ;;  %p1170_p3 = scmp.lt.s32.totalorder %s910_s21, %s1168_s16 }
 0x3d6   : > { %p1165_p1 = pnand %p1164_p0, %p1334_p4  ;;  %p1171_p5 = scmp.lt.s32.totalorder %s1169_s27, %s1163_s15 }
 0x3d8   : > { %p1166_p2 = pneg %p1165_p1  ;;  %p1172_p6 = por %p1171_p5, %p1170_p3 }
 0x3da   : > { %p1173_p7 = pnand %p1172_p6, %p1166_p2 }
 0x44b   : > { %v859_v23 = vpop.xlane.xlu0 %858 }
 0x44c   : > { %v860_v24 = vrot.slane %v859_v23, 4 }
 0x44e   : > { %v861_v27 = vadd.f32 %v860_v24, %v859_v23 }
 0x450   : > { %v862_v28 = vrot.slane %v861_v27, 2 }
 0x452   : > { %v863_v29 = vadd.f32 %v862_v28, %v861_v27 }
 0x454   : > { %v864_v30 = vrot.slane %v863_v29, 1 }
 0x456   : > { %v865_v33 = vadd.f32 %v864_v30, %v863_v29 }
 0x458   : > { %1038 = vpush %v865_v33 }
 0x489   : > { %s1039_s12 = spop %1038 }
 0x48a   : > { %v867_v36 = vstv %s1039_s12 }
 0x48b   : > { %v868_v37 = vmax.f32 %v867_v36, 1e-24 }
 0x48d   : > { %1135 = vrsqrt.f32 %v868_v37 }
 0x49a   : > { %v1136_v38 = vpop.eup %1135 }
 0x49b   : > { %v870_v39 = vmul.f32 %v1136_v38, %v855_v20 }
 0x49d   : > { %871 = vst.msk [vmem:[%s307_s19] sm:$0xff] %vm579_vm0, %v870_v39 }
 0x49e   : > { %1176 = shalt.err (!%p1173_p7)
}
 0x49f   : > { %s1177_s12 = scalar_lea.hbm %s907_s30, 128  ;;  %s1181_s18 = scalar_lea.hbm %s1589_s7, 256 }
 0x4a0   : > { %p1178_p9 = scmp.ne.s32.totalorder %s907_s30, %s1177_s12  ;;  %p1182_p12 = scmp.lt.s32.totalorder %s907_s30, %s1589_s7 }
 0x4a1   : > { %p1183_p13 = scmp.lt.s32.totalorder %s1181_s18, %s1177_s12 }
 0x4a2   : > { %p1179_p10 = pnand %p1178_p9, %p1334_p4 }
 0x4a3   : > { %p1184_p0 = por %p1183_p13, %p1182_p12 }
 0x4a4   : > { %p1180_p11 = pneg %p1179_p10 }
 0x4a6   : > { %p1185_p1 = pnand %p1184_p0, %p1180_p11 }
 0x4a8   : > { %1188 = shalt.err (!%p1185_p1)
}
 0x4a9   : > { %1041 = dma.vmem_to_hbm [thread:$0]  (%p1334_p4), %s910_s21, 128, %s907_s30, %s878_s22  }
 0x4aa PF: > { %p1051_p2 = scmp.ge.s32.totalorder %s1243_s29, 2  ;;  %s921_s23 = sand.u32 1, %s1223_s24  }
 0x4ab   : > { %s922_s15 = scalar_lea.sflag [#allocation5], %s921_s23 }
 0x4ac   : > { %p1045_p3 = pnand %p1051_p2, %p1341_p8 }
 0x4ae   : > { %p1046_p5 = pneg %p1045_p3 }
 0x4b0   : > { %1214 = dma.done.wait (%p1046_p5), %s922_s15, 1024  }
 0x4b1   : > { %1216 = vsyncadd (%p1046_p5), %s922_s15, 4294966272  ;;  %s931_s10 = scalar_lea.sflag [#allocation7], %s921_s23 }
 0x4b2   : > { %1218 = dma.done.wait (%p1046_p5), %s931_s10, 128  }
 0x4b3   : > { %1220 = vsyncadd (%p1046_p5), %s931_s10, 4294967168  ;;  %s24_s29 = sadd.s32 1, %s1243_s29   ;;  %s1592_s24 = smov %s1227_s25 }
 0x4b4   : > { %p21_p6 = scmp.ge.s32.totalorder %s24_s29, 4   ;;  %s1593_s25 = smov %s1231_s26 }
 0x4b5   : > { %s1594_s26 = smov %s1347_s14  ;;  %s1595_s27 = smov %s1239_s28 }
 0x4b6   : > { %s1596_s28 = smov %s1598_s9  ;;  %23 = sbr.rel (!%p21_p6) target bundleno = 6 (0x6), region = 104 }
 0x4bb   :  { %936 = vsyncpa [#allocation5], 1 }
 0x4bc   :  { %938 = vsyncpa [#allocation5 + $0x1], 1 }
 0x4bd   :  { %939 = vsyncpa [#allocation7], 1 }
 0x4be   :  { %941 = vsyncpa [#allocation7 + $0x1], 1 }

</bundles_post_ra>
